<compile_context>
chip_gen: v7x
topology: tpu7x:2x2x1
jax: 0.10.0
libtpu: 0.0.40
codegen_flags: <defaults>
</compile_context>

<pallas_src>
import functools

import jax
import jax.numpy as jnp
from jax.experimental import pallas as pl
from jax.experimental.pallas import tpu as pltpu


# ---------------------------------------------------------------------------
# Small helpers / device introspection
# ---------------------------------------------------------------------------

def _cdiv(a, b):
    return -(-a // b)


def _device_kind() -> str:
    try:
        return jax.devices()[0].device_kind.lower()
    except Exception:
        return ""


def _is_v7(kind: str) -> bool:
    return ("v7" in kind) or ("tpu7" in kind) or ("7x" in kind)


@functools.lru_cache(maxsize=1)
def _vmem_capacity_bytes() -> int:
    try:
        cap = int(getattr(pltpu.get_tpu_info(), "vmem_capacity_bytes", 0))
        if cap > 0:
            return cap
    except Exception:
        pass
    return 32 << 20  # conservative fallback


@functools.lru_cache(maxsize=1)
def _single_buffer_ok() -> bool:
    """Probe whether pipeline_mode=pl.Buffered(1) lowers on this runtime."""
    def _copy(x_ref, o_ref):
        o_ref[...] = x_ref[...]

    try:
        fn = pl.pallas_call(
            _copy,
            out_shape=jax.ShapeDtypeStruct((8, 128), jnp.float32),
            grid=(2,),
            in_specs=[pl.BlockSpec((8, 128), lambda i: (0, 0),
                                   pipeline_mode=pl.Buffered(1))],
            out_specs=pl.BlockSpec((8, 128), lambda i: (0, 0)),
        )
        jax.block_until_ready(fn(jnp.zeros((8, 128), jnp.float32)))
        return True
    except Exception:
        return False


def _vmem_limit(need_bytes: int, cap_bytes: int) -> int:
    # Never request more scoped VMEM than the chip physically has (v7x: 64 MiB).
    return int(min(cap_bytes - (4 << 20), max(need_bytes + (4 << 20), 32 << 20)))


# ---------------------------------------------------------------------------
# Kernels
# ---------------------------------------------------------------------------

def _flat_kernel(x_ref, pos_ref, row0_ref, o_ref):
    """Flattened path (D % 128 == 0): all stores are lane/sublane aligned.

    x_ref (tb, N*D); pos_ref (1, N*D); row0_ref (1, D); o_ref (tb, (N+1)*D).
    """
    tb = o_ref.shape[0]
    d = row0_ref.shape[1]
    o_ref[:, :d] = jnp.broadcast_to(row0_ref[...], (tb, d)).astype(o_ref.dtype)
    o_ref[:, d:] = (x_ref[...] + pos_ref[...]).astype(o_ref.dtype)


def _full_kernel(x_ref, pos_ref, row0_ref, o_ref):
    """Full-sequence 3-D path.

    x_ref (tb, N, D); pos_ref (1, N, D); row0_ref (1, 1, D); o_ref (tb, N+1, D).
    """
    tb = o_ref.shape[0]
    d = o_ref.shape[2]
    o_ref[:, 1:, :] = (x_ref[...] + pos_ref[...]).astype(o_ref.dtype)
    o_ref[:, 0:1, :] = jnp.broadcast_to(row0_ref[...], (tb, 1, d)).astype(o_ref.dtype)


def _tiled_kernel(x_ref, pos_ref, cls_ref, o_ref, carry_ref):
    """Sequence-tiled path (huge N*D).  Per-block shapes:

    x_ref   (tb, ts, D) : patch tokens [s*ts, (s+1)*ts)  (index clamped at the tail)
    pos_ref (1,  ts, D) : pos rows     [s*ts, (s+1)*ts)
    cls_ref (1,  1,  D)
    o_ref   (tb, ts, D) : output rows  [s*ts, (s+1)*ts)
    carry_ref (nb*tb, D): last patch row of the previous sequence tile, per batch row.
    """
    s = pl.program_id(0)
    b = pl.program_id(1)
    tb, ts, d = o_ref.shape
    row = pl.multiple_of(b * tb, tb)

    prev = carry_ref[pl.ds(row, tb), :]                       # token s*ts - 1 (stale at s==0)
    cls = jnp.broadcast_to(cls_ref[0, 0, :], prev.shape)
    first = jnp.where(s == 0, cls, prev)                      # cls token on the first tile

    o_ref[:, 0, :] = (first + pos_ref[0, 0, :]).astype(o_ref.dtype)
    o_ref[:, 1:, :] = (x_ref[:, : ts - 1, :] + pos_ref[:, 1:, :]).astype(o_ref.dtype)
    carry_ref[pl.ds(row, tb), :] = x_ref[:, ts - 1, :].astype(carry_ref.dtype)


# ---------------------------------------------------------------------------
# pallas_call wrappers for each path
# ---------------------------------------------------------------------------

def _call_flat(x, cls_token, pos_embed, out_dtype, tb, pos_bufs, vmem_cap, need):
    B, N, D = x.shape
    row0 = (cls_token[:, 0, :] + pos_embed[:, 0, :]).astype(out_dtype)      # (1, D)
    pos_rest = pos_embed[:, 1:, :].reshape(1, N * D).astype(out_dtype)      # (1, N*D)
    x2 = x.reshape(B, N * D)
    nb = _cdiv(B, tb)
    res_kwargs = {"pipeline_mode": pl.Buffered(1)} if pos_bufs == 1 else {}

    out2 = pl.pallas_call(
        _flat_kernel,
        out_shape=jax.ShapeDtypeStruct((B, (N + 1) * D), out_dtype),
        grid=(nb,),
        in_specs=[
            pl.BlockSpec((tb, N * D), lambda b: (b, 0)),
            pl.BlockSpec((1, N * D), lambda b: (0, 0), **res_kwargs),
            pl.BlockSpec((1, D), lambda b: (0, 0), **res_kwargs),
        ],
        out_specs=pl.BlockSpec((tb, (N + 1) * D), lambda b: (b, 0)),
        compiler_params=pltpu.CompilerParams(
            dimension_semantics=("parallel",),
            vmem_limit_bytes=_vmem_limit(need, vmem_cap),
        ),
    )(x2, pos_rest, row0)
    return out2.reshape(B, N + 1, D)


def _call_3d_full(x, cls_token, pos_embed, out_dtype, tb, pos_bufs, vmem_cap, need):
    B, N, D = x.shape
    row0 = (cls_token + pos_embed[:, :1, :]).astype(out_dtype)              # (1, 1, D)
    pos_rest = pos_embed[:, 1:, :].astype(out_dtype)                        # (1, N, D)
    nb = _cdiv(B, tb)
    res_kwargs = {"pipeline_mode": pl.Buffered(1)} if pos_bufs == 1 else {}

    return pl.pallas_call(
        _full_kernel,
        out_shape=jax.ShapeDtypeStruct((B, N + 1, D), out_dtype),
        grid=(nb,),
        in_specs=[
            pl.BlockSpec((tb, N, D), lambda b: (b, 0, 0)),
            pl.BlockSpec((1, N, D), lambda b: (0, 0, 0), **res_kwargs),
            pl.BlockSpec((1, 1, D), lambda b: (0, 0, 0), **res_kwargs),
        ],
        out_specs=pl.BlockSpec((tb, N + 1, D), lambda b: (b, 0, 0)),
        compiler_params=pltpu.CompilerParams(
            dimension_semantics=("parallel",),
            vmem_limit_bytes=_vmem_limit(need, vmem_cap),
        ),
    )(x, pos_rest, row0)


def _call_3d_tiled(x, cls_token, pos_embed, out_dtype, tb, ts, vmem_cap, need):
    B, N, D = x.shape
    nb = _cdiv(B, tb)
    ns = _cdiv(N + 1, ts)
    x_max_blk = max(_cdiv(N, ts) - 1, 0)   # clamp fully out-of-range x blocks
    pos_f = pos_embed.astype(out_dtype)
    cls_f = cls_token.astype(out_dtype)

    return pl.pallas_call(
        _tiled_kernel,
        out_shape=jax.ShapeDtypeStruct((B, N + 1, D), out_dtype),
        # Sequence axis outer (and sequential) so each pos tile is DMA'd once;
        # batch axis inner/parallel so megacore chips can shard it.
        grid=(ns, nb),
        in_specs=[
            pl.BlockSpec((tb, ts, D), lambda s, b: (b, jnp.minimum(s, x_max_blk), 0)),
            pl.BlockSpec((1, ts, D), lambda s, b: (0, s, 0)),
            pl.BlockSpec((1, 1, D), lambda s, b: (0, 0, 0)),
        ],
        out_specs=pl.BlockSpec((tb, ts, D), lambda s, b: (b, s, 0)),
        scratch_shapes=[pltpu.VMEM((nb * tb, D), out_dtype)],
        compiler_params=pltpu.CompilerParams(
            dimension_semantics=("arbitrary", "parallel"),
            vmem_limit_bytes=_vmem_limit(need, vmem_cap),
        ),
    )(x, pos_f, cls_f)


# ---------------------------------------------------------------------------
# Public entry point
# ---------------------------------------------------------------------------

def vit_embedding(x, cls_token, pos_embed, *, target_block_bytes=None):
    """x: (B, N, D); cls_token: (1, 1, D); pos_embed: (1, N+1, D) -> (B, N+1, D)."""
    B, N, D = x.shape
    assert cls_token.shape == (1, 1, D)
    assert pos_embed.shape == (1, N + 1, D)

    kind = _device_kind()
    is_v7 = _is_v7(kind)
    if target_block_bytes is None:
        # v7x (3.2 TB/s HBM) amortizes the ~0.35us per-step overhead with larger blocks.
        target_block_bytes = (10 << 20) if is_v7 else (4 << 20)
    min_steps = 2 if is_v7 else 1       # keep both v7x TensorCores fed via the batch axis

    out_dtype = jnp.result_type(x.dtype, cls_token.dtype, pos_embed.dtype)
    x_is = jnp.dtype(x.dtype).itemsize
    o_is = jnp.dtype(out_dtype).itemsize

    vmem_cap = _vmem_capacity_bytes()
    budget = max(vmem_cap - (8 << 20), vmem_cap // 2)
    pos_bufs = 1 if _single_buffer_ok() else 2

    def need_full(tb_):
        # double-buffered x/out blocks + resident pos/row0 (+1 MiB slack).
        return (2 * tb_ * N * D * x_is + 2 * tb_ * (N + 1) * D * o_is
                + pos_bufs * (N * D + D) * o_is + (1 << 20))

    row_bytes_x = max(N * D * x_is, 1)
    tb_pref = min(B, max(1, target_block_bytes // row_bytes_x))
    if min_steps > 1 and B >= min_steps:
        tb_pref = min(tb_pref, _cdiv(B, min_steps))

    # ---- Path A: flattened 2-D, fully aligned stores (needs D % 128 == 0) -----
    if D % 128 == 0:
        # In 2-D the batch dim is the sublane dim: tile must be %8 or == B.
        cands = sorted({B, *range(8, B, 8)})
        fitting = [t for t in cands if need_full(t) <= budget]
        if fitting:
            preferred = [t for t in fitting if t <= tb_pref]
            tb = preferred[-1] if preferred else fitting[0]
            return _call_flat(x, cls_token, pos_embed, out_dtype, tb,
                              pos_bufs, vmem_cap, need_full(tb))

    # ---- 3-D paths (unaligned D, or flattened full-sequence blocks don't fit) --
    tb = tb_pref
    while tb > 1 and need_full(tb) > budget:
        tb = max(1, tb // 2)

    if need_full(tb) <= budget and (row_bytes_x <= target_block_bytes or N < 8):
        return _call_3d_full(x, cls_token, pos_embed, out_dtype, tb,
                             pos_bufs, vmem_cap, need_full(tb))
    if N < 8:
        # Too few patch rows to sequence-tile; best effort with full-seq blocks.
        # TODO(synk): tile the embedding dim D for the (tiny N, enormous D) corner.
        return _call_3d_full(x, cls_token, pos_embed, out_dtype, tb,
                             pos_bufs, vmem_cap, need_full(tb))

    # ---- Path B2: sequence-tiled (huge N*D, or forced via a small byte target) -
    ts_cap = max(8, (N // 8) * 8)
    ts_pref = max(8, ((target_block_bytes // max(tb * D * max(x_is, o_is), 1)) // 8) * 8)
    ts = min(ts_cap, ts_pref)

    def need_tiled(tb_, ts_):
        return (2 * tb_ * ts_ * D * x_is + 2 * tb_ * ts_ * D * o_is
                + 2 * (ts_ * D + D) * o_is                 # pos tile + cls
                + _cdiv(B, tb_) * tb_ * D * o_is           # carry rows
                + (1 << 20))

    while ts > 8 and need_tiled(tb, ts) > budget:
        ts -= 8
    while tb > 1 and need_tiled(tb, ts) > budget:
        tb = max(1, tb // 2)

    return _call_3d_tiled(x, cls_token, pos_embed, out_dtype, tb, ts,
                          vmem_cap, need_tiled(tb, ts))


def vit_embedding_ref(x, cls_token, pos_embed):
    """Pure-JAX reference matching the PyTorch forward (with jnp dtype promotion)."""
    B, _, D = x.shape
    cls = jnp.broadcast_to(cls_token, (B, 1, D))
    return jnp.concatenate([cls, x], axis=1) + pos_embed


# ---------------------------------------------------------------------------
# Self-test
# ---------------------------------------------------------------------------

def _check(B, N, D, x_dtype=jnp.float32, p_dtype=jnp.float32, target=None):
    key = jax.random.PRNGKey(0)
    kc, kp, kx = jax.random.split(key, 3)
    cls_token = jax.random.normal(kc, (1, 1, D), dtype=p_dtype)
    pos_embed = jax.random.normal(kp, (1, N + 1, D), dtype=p_dtype)
    x = jax.random.normal(kx, (B, N, D), dtype=x_dtype)

    fn = vit_embedding if target is None else functools.partial(
        vit_embedding, target_block_bytes=target)
    out = jax.block_until_ready(jax.jit(fn)(x, cls_token, pos_embed))

    expected = vit_embedding_ref(x, cls_token, pos_embed)
    assert out.shape == expected.shape, (out.shape, expected.shape)
    assert out.dtype == expected.dtype, (out.dtype, expected.dtype)
    tol = 1e-6 if x_dtype == jnp.float32 else 2e-2
    assert jnp.allclose(out, expected, atol=tol, rtol=tol), \
        f"mismatch B={B} N={N} D={D} dtype={x_dtype}"


if __name__ == "__main__":
    # Warm the runtime probes outside of any jit trace.
    _single_buffer_ok()
    _vmem_capacity_bytes()

    _check(2, 8, 32)                                   # B1: full-sequence 3-D, single step
    _check(2, 8, 128)                                  # A : flattened, aligned stores
    _check(3, 8, 32, target=2048)                      # B1: ragged batch tiling (tb=2 over B=3)
    _check(3, 8, 32, target=512)                       # B2: sequence-tiled with carried row
    _check(10, 4, 128, target=2048)                    # A : tb=8 over B=10 (ragged sublane block)
    _check(2, 8, 128, x_dtype=jnp.bfloat16)            # A : bf16 x + f32 params -> f32 out

    print("KERNEL_OK")
</pallas_src>

<mosaic_0001>
module attributes {stable_mosaic.version = 11 : i64} {
  func.func @_copy(%arg0: i32, %arg1: memref<8x128xf32, #tpu.memory_space<vmem>>, %arg2: memref<8x128xf32, #tpu.memory_space<vmem>>) attributes {dimension_semantics = [#tpu.dimension_semantics<arbitrary>], iteration_bounds = array<i64: 2>, scalar_prefetch = 0 : i64, scratch_operands = 0 : i64, tpu.core_type = #tpu.core_type<tc>, window_params = [{pipeline_mode = #tpu.pipeline_mode<synchronous>, transform_indices = @transform_0, window_bounds = array<i64: 8, 128>}, {pipeline_mode = #tpu.pipeline_mode<synchronous>, transform_indices = @transform_1, window_bounds = array<i64: 8, 128>}]} {
    %c0 = arith.constant 0 : index
    %c0_0 = arith.constant 0 : index
    %0 = vector.load %arg1[%c0, %c0_0] : memref<8x128xf32, #tpu.memory_space<vmem>>, vector<8x128xf32>
    %c0_1 = arith.constant 0 : index
    %c0_2 = arith.constant 0 : index
    %1 = vector.load %arg2[%c0_1, %c0_2] : memref<8x128xf32, #tpu.memory_space<vmem>>, vector<8x128xf32>
    tpu.vector_store %arg2[%c0_1, %c0_2], %0 {strides = array<i32>} : memref<8x128xf32, #tpu.memory_space<vmem>>, vector<8x128xf32>,
    return
  }
  func.func @transform_0(%arg0: i32) -> (i32, i32) {
    %c0_i32 = arith.constant 0 : i32
    %c0_i32_0 = arith.constant 0 : i32
    %c0_i32_1 = arith.constant 0 : i32
    return %c0_i32, %c0_i32_0 : i32, i32
  }
  func.func @transform_1(%arg0: i32) -> (i32, i32) {
    %c0_i32 = arith.constant 0 : i32
    %c0_i32_0 = arith.constant 0 : i32
    %c0_i32_1 = arith.constant 0 : i32
    return %c0_i32, %c0_i32_0 : i32, i32
  }
}

module attributes {stable_mosaic.version = 11 : i64} {
  func.func @_full_kernel(%arg0: i32, %arg1: memref<2x8x32xf32, #tpu.memory_space<vmem>>, %arg2: memref<1x8x32xf32, #tpu.memory_space<vmem>>, %arg3: memref<1x1x32xf32, #tpu.memory_space<vmem>>, %arg4: memref<2x9x32xf32, #tpu.memory_space<vmem>>) attributes {dimension_semantics = [#tpu.dimension_semantics<parallel>], iteration_bounds = array<i64: 1>, scalar_prefetch = 0 : i64, scratch_operands = 0 : i64, tpu.core_type = #tpu.core_type<tc>, window_params = [{transform_indices = @transform_0, window_bounds = array<i64: 2, 8, 32>}, {pipeline_mode = #tpu.pipeline_mode<synchronous>, transform_indices = @transform_1, window_bounds = array<i64: 1, 8, 32>}, {pipeline_mode = #tpu.pipeline_mode<synchronous>, transform_indices = @transform_2, window_bounds = array<i64: 1, 1, 32>}, {transform_indices = @transform_3, window_bounds = array<i64: 2, 9, 32>}]} {
    %c0 = arith.constant 0 : index
    %c0_0 = arith.constant 0 : index
    %c0_1 = arith.constant 0 : index
    %0 = vector.load %arg1[%c0, %c0_0, %c0_1] : memref<2x8x32xf32, #tpu.memory_space<vmem>>, vector<2x8x32xf32>
    %c0_2 = arith.constant 0 : index
    %c0_3 = arith.constant 0 : index
    %c0_4 = arith.constant 0 : index
    %1 = vector.load %arg2[%c0_2, %c0_3, %c0_4] : memref<1x8x32xf32, #tpu.memory_space<vmem>>, vector<1x8x32xf32>
    %2 = vector.broadcast %1 : vector<1x8x32xf32> to vector<2x8x32xf32>
    %3 = arith.addf %0, %2 : vector<2x8x32xf32>
    %c0_5 = arith.constant 0 : index
    %c1 = arith.constant 1 : index
    %c0_6 = arith.constant 0 : index
    %4 = vector.load %arg4[%c0_5, %c1, %c0_6] : memref<2x9x32xf32, #tpu.memory_space<vmem>>, vector<2x8x32xf32>
    tpu.vector_store %arg4[%c0_5, %c1, %c0_6], %3 {strides = array<i32>} : memref<2x9x32xf32, #tpu.memory_space<vmem>>, vector<2x8x32xf32>,
    %c0_7 = arith.constant 0 : index
    %c0_8 = arith.constant 0 : index
    %c0_9 = arith.constant 0 : index
    %5 = vector.load %arg3[%c0_7, %c0_8, %c0_9] : memref<1x1x32xf32, #tpu.memory_space<vmem>>, vector<1x1x32xf32>
    %6 = vector.shape_cast %5 : vector<1x1x32xf32> to vector<1x1x32xf32>
    %7 = vector.broadcast %6 : vector<1x1x32xf32> to vector<2x1x32xf32>
    %c0_10 = arith.constant 0 : index
    %c0_11 = arith.constant 0 : index
    %c0_12 = arith.constant 0 : index
    %8 = vector.load %arg4[%c0_10, %c0_11, %c0_12] : memref<2x9x32xf32, #tpu.memory_space<vmem>>, vector<2x1x32xf32>
    tpu.vector_store %arg4[%c0_10, %c0_11, %c0_12], %7 {strides = array<i32>} : memref<2x9x32xf32, #tpu.memory_space<vmem>>, vector<2x1x32xf32>,
    return
  }
  func.func @transform_0(%arg0: i32) -> (i32, i32, i32) {
    %c0_i32 = arith.constant 0 : i32
    %c0_i32_0 = arith.constant 0 : i32
    %c0_i32_1 = arith.constant 0 : i32
    return %arg0, %c0_i32, %c0_i32_0 : i32, i32, i32
  }
  func.func @transform_1(%arg0: i32) -> (i32, i32, i32) {
    %c0_i32 = arith.constant 0 : i32
    %c0_i32_0 = arith.constant 0 : i32
    %c0_i32_1 = arith.constant 0 : i32
    %c0_i32_2 = arith.constant 0 : i32
    return %c0_i32, %c0_i32_0, %c0_i32_1 : i32, i32, i32
  }
  func.func @transform_2(%arg0: i32) -> (i32, i32, i32) {
    %c0_i32 = arith.constant 0 : i32
    %c0_i32_0 = arith.constant 0 : i32
    %c0_i32_1 = arith.constant 0 : i32
    %c0_i32_2 = arith.constant 0 : i32
    return %c0_i32, %c0_i32_0, %c0_i32_1 : i32, i32, i32
  }
  func.func @transform_3(%arg0: i32) -> (i32, i32, i32) {
    %c0_i32 = arith.constant 0 : i32
    %c0_i32_0 = arith.constant 0 : i32
    %c0_i32_1 = arith.constant 0 : i32
    return %arg0, %c0_i32, %c0_i32_0 : i32, i32, i32
  }
}

</mosaic_0001>

<bundles_post_ra>
// kernel: tpu_custom_call.1
= control target key start
LH: loop header
LB: loop body
LE: loop exit
PB: predicated region body
PF: predicated region fallthrough
CT: control target
= control target key end

     0   :  { %6 = vsyncpa [#allocation3], 0  ;;  %s340_s0 = inlined_call_operand.hbm [shape: f32[8,128], index: 0, kind: input, shape index: {}]   ;;  %s341_s1 = inlined_call_operand.hbm [shape: f32[8,128], index: 1, kind: output, shape index: {}]  }
   0x1   :  { %7 = vsyncpa [#allocation4], 0  ;;  %s261_s6 = smov 0  }
   0x2 LB: > { %s144_s7 = sadd.s32 4294967295, %s247_s6   ;;  %p145_p0 = scmp.ge.s32.totalorder %s247_s6, 1  ;;  %s247_s6 = sphi %s261_s6, %s13_s6  }
   0x3   : > { %p60_p1 = scmp.lt.s32.totalorder %s247_s6, 3  ;;  %p275_p3 = scmp.eq.s32.totalorder %s144_s7, 0 }
   0x4   : > { %s249_s10 = smov [#allocation2]   ;;  %s179_s15 = scalar_lea.hbm %s340_s0, 128 }
   0x5   : > { %p269_p2 = pnand %p145_p0, %p60_p1  ;;  %s73_s11 = sshll.u32 %s249_s10, 4  ;;  %s74_s11 = int_to_ptr.vmem [resolvable:$true] %s73_s11 }
   0x6   : > { %s346_s9 = scalar_select %p275_p3, 1, 0 }
   0x7   : > { %s345_s8 = scalar_select %p269_p2, 1, 0 }
   0x8   : > { %p161_p4 = pneg %p269_p2  ;;  %p180_p6 = scmp.ne.s32.totalorder %s340_s0, %s179_s15 }
   0x9   : > { %p186_p10 = scmp.lt.u32.totalorder %s179_s15, %s340_s0 }
   0xa   : > { %p283_p5 = pnand %p275_p3, %p161_p4 }
   0xc   : > { %p181_p7 = pneg %p283_p5 }
   0xe   : > { %p182_p8 = pnand %p181_p7, %p180_p6 }
  0x10   : > { %p183_p9 = pneg %p182_p8 }
  0x12   : > { %p188_p11 = pnand %p186_p10, %p183_p9 }
  0x14   : > { %191 = shalt.err (!%p188_p11)
}
  0x15   : > { %s192_s20 = scalar_lea.vmem %s74_s11, 128  ;;  %p200_p1 = scmp.lt.s32.totalorder %s74_s11, %s74_s11 }
  0x16   : > { %p193_p12 = scmp.ne.s32.totalorder %s74_s11, %s192_s20  ;;  %p201_p4 = scmp.lt.s32.totalorder %s192_s20, %s192_s20 }
  0x18   : > { %p195_p13 = pnand %p193_p12, %p181_p7  ;;  %p202_p3 = por %p201_p4, %p200_p1 }
  0x1a   : > { %p196_p0 = pneg %p195_p13 }
  0x1c   : > { %p203_p2 = pnand %p202_p3, %p196_p0 }
  0x1e   : > { %206 = shalt.err (!%p203_p2)
}
  0x1f   : > { %164 = dma.hbm_to_vmem [thread:$0]  (!%p283_p5), %s340_s0, 128, %s74_s11, [#allocation3]  }
  0x20   : > { %p348_p6 = scmp.ne.s32.totalorder %s345_s8, 0 }
  0x21   : > { %p349_p8 = scmp.ne.s32.totalorder (!%p348_p6), %s346_s9, 0 }
  0x22   : > { %86 = sbr.rel (%p348_p6) target bundleno = 67 (0x43), region = 24 }
  0x29   : > { %238 = dma.done.wait (%p349_p8), [#allocation3], 128  }
  0x2a   : > { %240 = vsyncadd (%p349_p8), [#allocation3], 4294967168  ;;  %s250_s23 = smov [#allocation5]   ;;  %p311_p2 = scmp.eq.s32.totalorder %s144_s7, 1  ;;  %v96_v0 = vld [vmem:[#allocation2] sm:$0xff] }
  0x2b   : > { %s105_s24 = sshll.u32 %s250_s23, 4  ;;  %97 = vst [vmem:[#allocation5] sm:$0xff] %v96_v0  ;;  %s106_s24 = int_to_ptr.vmem [resolvable:$true] %s105_s24 }
  0x2c   : > { %s207_s26 = scalar_lea.vmem %s106_s24, 128  ;;  %p214_p9 = scmp.lt.s32.totalorder %s106_s24, %s106_s24 }
  0x2d   : > { %p208_p3 = scmp.ne.s32.totalorder %s106_s24, %s207_s26  ;;  %p215_p10 = scmp.lt.s32.totalorder %s207_s26, %s207_s26 }
  0x2f   : > { %p209_p5 = pnand %p208_p3, %p311_p2  ;;  %p216_p11 = por %p215_p10, %p214_p9 }
  0x31   : > { %p210_p7 = pneg %p209_p5 }
  0x33   : > { %p217_p12 = pnand %p216_p11, %p210_p7 }
  0x35   : > { %220 = shalt.err (!%p217_p12)
}
  0x36   : > { %s221_s29 = scalar_lea.hbm %s341_s1, 128 }
  0x37   : > { %p222_p13 = scmp.ne.s32.totalorder %s341_s1, %s221_s29  ;;  %p227_p4 = scmp.lt.u32.totalorder %s221_s29, %s341_s1 }
  0x39   : > { %p223_p0 = pnand %p222_p13, %p311_p2 }
  0x3b   : > { %p224_p1 = pneg %p223_p0 }
  0x3d   : > { %p229_p6 = pnand %p227_p4, %p224_p1 }
  0x3f   : > { %232 = shalt.err (!%p229_p6)
}
  0x40   : > { %158 = dma.vmem_to_hbm [thread:$0]  (%p311_p2), %s106_s24, 128, %s341_s1, [#allocation4]  }
  0x41   : > { %242 = dma.done.wait (%p311_p2), [#allocation4], 128  }
  0x42   : > { %244 = vsyncadd (%p311_p2), [#allocation4], 4294967168 }
  0x43 PF: > { %s13_s6 = sadd.s32 1, %s247_s6  }
  0x44   : > { %p10_p8 = scmp.ge.s32.totalorder %s13_s6, 4  }
  0x46   :  { %12 = sbr.rel (!%p10_p8) target bundleno = 2 (0x2), region = 53 }
  0x4d   :  { %118 = vsyncpa [#allocation3], 1 }
  0x4e   :  { %120 = vsyncpa [#allocation3 + $0x1], 1 }
  0x4f   :  { %121 = vsyncpa [#allocation4], 1 }
  0x50   :  { %123 = vsyncpa [#allocation4 + $0x1], 1 }

// kernel: vit_embedding.1
= control target key start
LH: loop header
LB: loop body
LE: loop exit
PB: predicated region body
PF: predicated region fallthrough
CT: control target
= control target key end

     0   :  { %8 = vsyncpa [#allocation3], 0  ;;  %s72_s12 = smov [#allocation2]   ;;  %s125_s0 = inlined_call_operand.hbm [shape: f32[2,8,32], index: 0, kind: input, shape index: {}]   ;;  %s126_s1 = inlined_call_operand.vmem [shape: f32[1,8,32], index: 1, kind: input, shape index: {}]   ;;  %s127_s2 = inlined_call_operand.vmem [shape: f32[1,1,32], index: 2, kind: input, shape index: {}]   ;;  %s128_s3 = inlined_call_operand.vmem [shape: f32[2,9,32], index: 3, kind: output, shape index: {}]  }
   0x1   :  { %s14_s13 = sshll.u32 %s72_s12, 4  ;;  %s48_s16 = scalar_lea.hbm %s125_s0, 256  ;;  %s15_s13 = int_to_ptr.vmem [resolvable:$true] %s14_s13 }
   0x2   :  { %p49_p0 = scmp.ne.s32.totalorder %s125_s0, %s48_s16  ;;  %p52_p1 = scmp.lt.u32.totalorder %s48_s16, %s125_s0 }
   0x4   :  { %p54_p2 = pnand %p52_p1, %p49_p0 }
   0x6   :  { %57 = shalt.err (!%p54_p2)
}
   0x7   :  { %s58_s21 = scalar_lea.vmem %s15_s13, 256  ;;  %p63_p4 = scmp.lt.s32.totalorder %s15_s13, %s15_s13 }
   0x8   :  { %p59_p3 = scmp.ne.s32.totalorder %s15_s13, %s58_s21  ;;  %p64_p5 = scmp.lt.s32.totalorder %s58_s21, %s58_s21 }
   0xa   :  { %p65_p6 = por %p64_p5, %p63_p4 }
   0xc   :  { %p66_p7 = pnand %p65_p6, %p59_p3 }
   0xe   :  { %69 = shalt.err (!%p66_p7)
}
   0xf   :  { %s73_s22 = smov 128   ;;  %s74_s23 = smov 8  }
  0x10   :  { %20 = dma.hbm_to_vmem [thread:$0]  %s125_s0, 256, %s15_s13, [#allocation3], %s73_s22, %s73_s22, %s74_s23  }
  0x11   :  { %70 = dma.done.wait [#allocation3], 256  }
  0x12   :  { %71 = vsyncadd [#allocation3], 4294967040  ;;  %vm37_vm0 = vcmask 253952   ;;  %v28_v0 = vld [vmem:[#allocation2] sm:$0xff]  ;;  %vm33_vm1 = vcmask 261120   ;;  %v29_v2 = vld [vmem:[#allocation2 + $0x8] sm:$0xff] }
  0x13   :  { %v30_v1 = vld [vmem:[%s126_s1] sm:$0xff] }
  0x14   :  { %v31_v3 = vadd.f32 %v30_v1, %v28_v0  ;;  %v32_v4 = vadd.f32 %v30_v1, %v29_v2  ;;  %v36_v5 = vld [vmem:[%s127_s2] sm:$0x1] }
  0x15   :  { %38 = vst.msk [vmem:[%s128_s3] sm:$0x1] %vm37_vm0, %v36_v5  ;;  %39 = vst.msk [vmem:[%s128_s3 + $0x10] sm:$0x1] %vm37_vm0, %v36_v5 }
  0x16   :  { %34 = vst.msk [vmem:[%s128_s3 + $0x1] sm:$0xff] %vm33_vm1, %v31_v3  ;;  %35 = vst.msk [vmem:[%s128_s3 + $0x11] sm:$0xff] %vm33_vm1, %v32_v4 }
  0x17   :  { %44 = vsyncpa [#allocation3], 1 }

</bundles_post_ra>
